<compile_context>
chip_gen: v7x
topology: tpu7x:2x2x1
jax: 0.10.0
libtpu: 0.0.40
codegen_flags: <defaults>
</compile_context>

<pallas_src>
import functools

import numpy as np
import jax
import jax.numpy as jnp
from jax.experimental import pallas as pl
from jax.experimental.pallas import tpu as pltpu

# ----------------------------- static configuration -------------------------
WIN = 32                        # filter_length == win_length
HOP = 8                         # hop_length
C_IN = 4                        # in_chan of the decoder ConvTranspose2d
N_SRC = 2                       # number of separated sources
K = 3                           # decoder kernel_size (stride=1, pad=(K-1)//2)
B = 2                           # batch
T = 16                          # number of STFT frames
F = WIN // 2 + 1                # frequency bins (cutoff) = 17
L_FULL = (T - 1) * HOP + WIN    # raw conv_transpose1d output length = 152
LENGTH = (T - 1) * HOP          # final audio length per source = 120
L_PAD = 256                     # lane-dense padded signal length (2 x 128 lanes)
BN = B * N_SRC                  # fused batch*src rows = 4
KDIM = C_IN * T * F             # 1088: x's natural (chan, frame, freq) flatten
KPAD = ((KDIM + 127) // 128) * 128   # 1152 = 9 * 128 (unmasked lane tiles)
TINY = float(np.finfo(np.float32).tiny)
SCALE = float(WIN) / float(HOP)


# ------------------------------- Pallas kernel -------------------------------
def _stft_decoder_kernel(x_ref, w_ref, norm_ref, out_ref):
    # x_ref    : (BN, KPAD)     bf16  spectrogram, natural (chan, frame, freq) flat
    # w_ref    : (KPAD, L_PAD)  bf16  conv + inverse-STFT basis + overlap-add fold
    # norm_ref : (1, L_PAD)     f32   SCALE / window_sumsquare (1 where <= tiny)
    # out_ref  : (BN, L_PAD)    f32   lane-dense synthesized signal (pre-crop)
    acc = jnp.dot(x_ref[...], w_ref[...], preferred_element_type=jnp.float32)
    out_ref[...] = acc * norm_ref[...]


# --------------------------- buffers (STFT.__init__) --------------------------
def make_istft_buffers(max_frames: int = 5200):
    """inverse_basis (2F, WIN) and window_sumsquare[:L_FULL], exactly as the module."""
    cutoff = F
    fourier = np.fft.fft(np.eye(WIN))
    fb = np.vstack([np.real(fourier[:cutoff]), np.imag(fourier[:cutoff])])  # (2F, WIN)
    scale = WIN / HOP
    hann = 0.5 - 0.5 * np.cos(2.0 * np.pi * np.arange(WIN) / WIN)           # periodic hann
    inv_basis = (np.linalg.pinv(scale * fb).T.astype(np.float32)
                 * hann[None, :].astype(np.float32))                        # (2F, WIN)

    n = WIN + HOP * (max_frames - 1)
    wss = np.zeros(n, np.float32)
    win_sq = hann.astype(np.float32) ** 2
    for i in range(max_frames):
        s = i * HOP
        wss[s:min(n, s + WIN)] += win_sq[:max(0, min(WIN, n - s))]
    # module registers the 5200-frame buffer and slices [:win_dim] at runtime
    return inv_basis, wss[:L_FULL].copy()


# -------------------- parameter fold (done once, numpy glue) ------------------
def fold_decoder_params(w_t, inv_basis, window_sum):
    """Fold ConvTranspose2d weights + inverse-STFT basis + overlap-add into one
    (KPAD, L_PAD) bf16 synthesis matrix, plus the pre-inverted normalization."""
    w_t = np.asarray(w_t, np.float32)                                  # (C_IN, 2, K, K)
    # ConvTranspose2d(stride=1, pad=(K-1)//2) == 'same' cross-correlation with
    # flipped, channel-transposed weights.
    w_conv = np.flip(np.transpose(w_t, (1, 0, 2, 3)), axis=(2, 3))     # (2, C_IN, K, K)
    basis_r, basis_i = inv_basis[:F], inv_basis[F:]                    # (F, WIN) each

    # K axis in x's natural (c, t', f') order; halo taps that would read the
    # zero conv padding are simply omitted.
    w_big = np.zeros((C_IN, T, F, L_PAD), np.float32)
    for t in range(T):                       # output frame -> OLA offset t*HOP
        lo = t * HOP
        for a in range(K):                   # frame tap: source row t' = t + a - 1
            tp = t + a - 1
            if tp < 0 or tp >= T:
                continue
            for c in range(C_IN):
                for b in range(K):           # freq tap: source col f' = f + b - 1
                    blk = (w_conv[0, c, a, b] * basis_r
                           + w_conv[1, c, a, b] * basis_i)             # (F, WIN)
                    f_lo = max(0, 1 - b)
                    f_hi = min(F, F + 1 - b)
                    w_big[c, tp, f_lo + b - 1:f_hi + b - 1, lo:lo + WIN] += blk[f_lo:f_hi]
    w_big = w_big.reshape(KDIM, L_PAD)

    w_pad = np.zeros((KPAD, L_PAD), np.float32)
    w_pad[:KDIM] = w_big

    # Pre-inverted window-sum normalization (divide-where-nonzero then *SCALE
    # becomes a single multiply in the kernel).
    ws = np.zeros(L_PAD, np.float32)
    ws[:L_FULL] = window_sum
    norm = np.full((1, L_PAD), SCALE, np.float32)
    nz = ws > TINY
    norm[0, nz] = SCALE / ws[nz]
    return jnp.asarray(w_pad, jnp.bfloat16), jnp.asarray(norm, jnp.float32)


# ------------------------------ JAX glue / wrapper ----------------------------
@functools.partial(jax.jit, static_argnames=("batch", "length"))
def stft_decoder_forward(x, w_big, norm, *, batch, length):
    """x: (B, n_src*in_chan, T, F) -> (batch, n_src, length)."""
    bn = batch * N_SRC
    # Pure layout plumbing (fused under jit): flatten to the natural K order,
    # cast to bf16, tail-pad K to a 128 multiple.
    x_flat = x.reshape(bn, KDIM).astype(jnp.bfloat16)
    x_in = jnp.pad(x_flat, ((0, 0), (0, KPAD - KDIM)))                 # (BN, KPAD)

    out = pl.pallas_call(
        _stft_decoder_kernel,
        out_shape=jax.ShapeDtypeStruct((bn, L_PAD), jnp.float32),
        grid_spec=pltpu.PrefetchScalarGridSpec(
            num_scalar_prefetch=0,
            grid=(1,),
            in_specs=[
                pl.BlockSpec((bn, KPAD), lambda i: (0, 0)),
                pl.BlockSpec((KPAD, L_PAD), lambda i: (0, 0)),
                pl.BlockSpec((1, L_PAD), lambda i: (0, 0)),
            ],
            out_specs=pl.BlockSpec((bn, L_PAD), lambda i: (0, 0)),
        ),
    )(x_in, w_big, norm)

    # Center crop (filter_length/2 each side) + final view — pure slicing.
    audio = out[:, WIN // 2: WIN // 2 + length]
    return audio.reshape(batch, N_SRC, length)


# ------------------------------ pure-JAX reference ---------------------------
def reference_forward(x, w_t, inv_basis, window_sum, *, batch, length):
    """Unfused f32 reference following the PyTorch module step by step, using the
    scatter-form ConvTranspose2d definition (independent of the kernel's fold)."""
    bn = batch * N_SRC
    xr = jnp.asarray(x, jnp.float32).reshape(bn, C_IN, T, F)
    w = jnp.asarray(w_t, jnp.float32)                                  # (C_IN, 2, K, K)
    pad = (K - 1) // 2

    # ConvTranspose2d (stride=1, padding=pad, bias=False), scatter form:
    # out[:, o, i + a - pad, j + b - pad] += in[:, c, i, j] * w[c, o, a, b]
    dec = jnp.zeros((bn, 2, T, F), jnp.float32)
    for a in range(K):
        for b in range(K):
            ii_lo = max(0, pad - a)
            ii_hi = T - max(0, a - pad)
            jj_lo = max(0, pad - b)
            jj_hi = F - max(0, b - pad)
            contrib = jnp.einsum('bcij,co->boij',
                                 xr[:, :, ii_lo:ii_hi, jj_lo:jj_hi], w[:, :, a, b])
            dec = dec.at[:, :, ii_lo + a - pad: ii_hi + a - pad,
                               jj_lo + b - pad: jj_hi + b - pad].add(contrib)

    real, imag = dec[:, 0], dec[:, 1]                                  # (bn, T, F)
    mag = jnp.sqrt(real ** 2 + imag ** 2)
    phase = jnp.arctan2(imag, real)
    rc, rs = mag * jnp.cos(phase), mag * jnp.sin(phase)

    inv = jnp.asarray(inv_basis, jnp.float32)                          # (2F, WIN)
    hp = jax.lax.Precision.HIGHEST
    sig = (jnp.einsum('btf,fn->btn', rc, inv[:F], precision=hp)
           + jnp.einsum('btf,fn->btn', rs, inv[F:], precision=hp))
    full = jnp.zeros((bn, L_FULL), jnp.float32)
    for t in range(T):
        full = full.at[:, t * HOP:t * HOP + WIN].add(sig[:, t])

    ws = jnp.asarray(window_sum, jnp.float32)[None, :]
    nz = ws > TINY
    full = jnp.where(nz, full / jnp.where(nz, ws, 1.0), full) * SCALE
    return full[:, WIN // 2: WIN // 2 + length].reshape(batch, N_SRC, length)


# ------------------------------------ main -----------------------------------
if __name__ == "__main__":
    key = jax.random.PRNGKey(0)
    k_x, k_w = jax.random.split(key)

    # module input: (batch, n_src * in_chan, T, F)
    x = jax.random.normal(k_x, (B, N_SRC * C_IN, T, F), jnp.float32)

    # deterministic xavier-uniform-style init for the ConvTranspose2d weight
    # (in_channels, out_channels, K, K)
    bound = float(np.sqrt(6.0 / ((C_IN + 2) * K * K)))
    w_t = jax.random.uniform(k_w, (C_IN, 2, K, K), jnp.float32, -bound, bound)

    inv_basis, window_sum = make_istft_buffers(max_frames=5200)
    w_big, norm = fold_decoder_params(np.asarray(w_t), inv_basis, window_sum)

    out = stft_decoder_forward(x, w_big, norm, batch=B, length=LENGTH)
    out = jax.block_until_ready(out)
    assert out.shape == (B, N_SRC, LENGTH)

    ref = reference_forward(x, w_t, inv_basis, window_sum, batch=B, length=LENGTH)
    max_err = float(jnp.max(jnp.abs(out - ref)))
    assert max_err < 2e-2, f"mismatch vs reference: {max_err}"

    print("KERNEL_OK")
</pallas_src>

<mosaic_0001>
module attributes {stable_mosaic.version = 11 : i64} {
  func.func @_stft_decoder_kernel(%arg0: i32, %arg1: memref<4x1152xbf16, #tpu.memory_space<vmem>>, %arg2: memref<1152x256xbf16, #tpu.memory_space<vmem>>, %arg3: memref<1x256xf32, #tpu.memory_space<vmem>>, %arg4: memref<4x256xf32, #tpu.memory_space<vmem>>) attributes {dimension_semantics = [#tpu.dimension_semantics<arbitrary>], iteration_bounds = array<i64: 1>, scalar_prefetch = 0 : i64, scratch_operands = 0 : i64, tpu.core_type = #tpu.core_type<tc>, window_params = [{pipeline_mode = #tpu.pipeline_mode<synchronous>, transform_indices = @transform_0, window_bounds = array<i64: 4, 1152>}, {pipeline_mode = #tpu.pipeline_mode<synchronous>, transform_indices = @transform_1, window_bounds = array<i64: 1152, 256>}, {pipeline_mode = #tpu.pipeline_mode<synchronous>, transform_indices = @transform_2, window_bounds = array<i64: 1, 256>}, {pipeline_mode = #tpu.pipeline_mode<synchronous>, transform_indices = @transform_3, window_bounds = array<i64: 4, 256>}]} {
    %c0 = arith.constant 0 : index
    %c0_0 = arith.constant 0 : index
    %0 = vector.load %arg1[%c0, %c0_0] : memref<4x1152xbf16, #tpu.memory_space<vmem>>, vector<4x1152xbf16>
    %c0_1 = arith.constant 0 : index
    %c0_2 = arith.constant 0 : index
    %1 = vector.load %arg2[%c0_1, %c0_2] : memref<1152x256xbf16, #tpu.memory_space<vmem>>, vector<1152x256xbf16>
    %cst = arith.constant dense<0.000000e+00> : vector<4x256xf32>
    %2 = tpu.matmul %0, %1, %cst {dimension_numbers = #tpu.dot_dimension_numbers<[1], [0], [0], [1], [0, 0, 1, 1], [], []>} : vector<4x1152xbf16>, vector<1152x256xbf16>, vector<4x256xf32> -> vector<4x256xf32>
    %c0_3 = arith.constant 0 : index
    %c0_4 = arith.constant 0 : index
    %3 = vector.load %arg3[%c0_3, %c0_4] : memref<1x256xf32, #tpu.memory_space<vmem>>, vector<1x256xf32>
    %4 = vector.broadcast %3 : vector<1x256xf32> to vector<4x256xf32>
    %5 = arith.mulf %2, %4 : vector<4x256xf32>
    %c0_5 = arith.constant 0 : index
    %c0_6 = arith.constant 0 : index
    %6 = vector.load %arg4[%c0_5, %c0_6] : memref<4x256xf32, #tpu.memory_space<vmem>>, vector<4x256xf32>
    tpu.vector_store %arg4[%c0_5, %c0_6], %5 {strides = array<i32>} : memref<4x256xf32, #tpu.memory_space<vmem>>, vector<4x256xf32>,
    return
  }
  func.func @transform_0(%arg0: i32) -> (i32, i32) {
    %c0_i32 = arith.constant 0 : i32
    %c0_i32_0 = arith.constant 0 : i32
    %c0_i32_1 = arith.constant 0 : i32
    return %c0_i32, %c0_i32_0 : i32, i32
  }
  func.func @transform_1(%arg0: i32) -> (i32, i32) {
    %c0_i32 = arith.constant 0 : i32
    %c0_i32_0 = arith.constant 0 : i32
    %c0_i32_1 = arith.constant 0 : i32
    return %c0_i32, %c0_i32_0 : i32, i32
  }
  func.func @transform_2(%arg0: i32) -> (i32, i32) {
    %c0_i32 = arith.constant 0 : i32
    %c0_i32_0 = arith.constant 0 : i32
    %c0_i32_1 = arith.constant 0 : i32
    return %c0_i32, %c0_i32_0 : i32, i32
  }
  func.func @transform_3(%arg0: i32) -> (i32, i32) {
    %c0_i32 = arith.constant 0 : i32
    %c0_i32_0 = arith.constant 0 : i32
    %c0_i32_1 = arith.constant 0 : i32
    return %c0_i32, %c0_i32_0 : i32, i32
  }
}

</mosaic_0001>

<bundles_post_ra>
// kernel: stft_decoder_forward.1
= control target key start
LH: loop header
LB: loop body
LE: loop exit
PB: predicated region body
PF: predicated region fallthrough
CT: control target
= control target key end

     0   :  { %8 = vsyncpa [#allocation3], 0  ;;  %s1584_s12 = smov [#allocation2]   ;;  %s1651_s0 = inlined_call_operand.vmem [shape: bf16[4,1152], index: 0, kind: input, shape index: {}]   ;;  %s1652_s1 = inlined_call_operand.hbm [shape: bf16[1152,256], index: 1, kind: input, shape index: {}]   ;;  %s1653_s2 = inlined_call_operand.vmem [shape: f32[1,256], index: 2, kind: input, shape index: {}]   ;;  %s1654_s3 = inlined_call_operand.vmem [shape: f32[4,256], index: 3, kind: output, shape index: {}]  }
   0x1   :  { %s16_s13 = sshll.u32 %s1584_s12, 4  ;;  %s1560_s16 = scalar_lea.hbm %s1652_s1, 18432  ;;  %s17_s13 = int_to_ptr.vmem [resolvable:$true] %s16_s13 }
   0x2   :  { %p1561_p0 = scmp.ne.s32.totalorder %s1652_s1, %s1560_s16  ;;  %p1564_p1 = scmp.lt.u32.totalorder %s1560_s16, %s1652_s1 }
   0x4   :  { %p1566_p2 = pnand %p1564_p1, %p1561_p0 }
   0x6   :  { %1569 = shalt.err (!%p1566_p2)
}
   0x7   :  { %s1570_s21 = scalar_lea.vmem %s17_s13, 18432  ;;  %p1575_p4 = scmp.lt.s32.totalorder %s17_s13, %s17_s13 }
   0x8   :  { %p1571_p3 = scmp.ne.s32.totalorder %s17_s13, %s1570_s21  ;;  %p1576_p5 = scmp.lt.s32.totalorder %s1570_s21, %s1570_s21 }
   0xa   :  { %p1577_p6 = por %p1576_p5, %p1575_p4 }
   0xc   :  { %p1578_p7 = pnand %p1577_p6, %p1571_p3 }
   0xe   :  { %1581 = shalt.err (!%p1578_p7)
}
   0xf   :  { %s1585_s22 = smov 128   ;;  %s1586_s23 = smov 8  }
  0x10   :  { %22 = dma.hbm_to_vmem [thread:$0]  %s1652_s1, 18432, %s17_s13, [#allocation3], %s1585_s22, %s1585_s22, %s1586_s23  }
  0x11   :  { %1582 = dma.done.wait [#allocation3], 18432  }
  0x12   :  { %1583 = vsyncadd [#allocation3], 4294948864  ;;  %v1342_v0 = vld [vmem:[#allocation2 + $0x4] ss:$8 sps:$4 sm:$0xff]   ;;  %v1346_v2 = vld [vmem:[#allocation2] ss:$8 sps:$4 sm:$0xff]   ;;  %v183_v38 = vlaneseq }
  0x13   :  { %v1344_v1 = vld [vmem:[#allocation2 + $0x204] ss:$8 sps:$4 sm:$0xff]   ;;  %949 = vmatprep.subr.bf16.mxu1 %v1342_v0  ;;  %v1347_v3 = vld [vmem:[#allocation2 + $0x200] ss:$8 sps:$4 sm:$0xff]   ;;  %v1348_v4 = vld [vmem:[#allocation2 + $0x14] ss:$8 sps:$4 sm:$0xff]  }
  0x14   :  { %1031 = vmatprep.subr.bf16.mxu0 %v1344_v1  ;;  %950 = vmatpush1.bf16.msra.mxu1 %v1346_v2  ;;  %v1350_v5 = vld [vmem:[#allocation2 + $0x214] ss:$8 sps:$4 sm:$0xff]   ;;  %v1352_v6 = vld [vmem:[#allocation2 + $0x10] ss:$8 sps:$4 sm:$0xff]   ;;  %v1354_v8 = vld [vmem:[#allocation2 + $0x24] ss:$8 sps:$4 sm:$0xff]  }
  0x15   :  { %1032 = vmatpush1.bf16.msra.mxu0 %v1347_v3  ;;  %951 = vmatprep.subr.bf16.mxu1 %v1348_v4  ;;  %v1353_v7 = vld [vmem:[#allocation2 + $0x210] ss:$8 sps:$4 sm:$0xff]   ;;  %v1356_v9 = vld [vmem:[#allocation2 + $0x224] ss:$8 sps:$4 sm:$0xff]   ;;  %v1358_v10 = vld [vmem:[#allocation2 + $0x20] ss:$8 sps:$4 sm:$0xff]  }
  0x16   :  { %1033 = vmatprep.subr.bf16.mxu0 %v1350_v5  ;;  %v1359_v11 = vld [vmem:[#allocation2 + $0x220] ss:$8 sps:$4 sm:$0xff]   ;;  %v1360_v12 = vld [vmem:[#allocation2 + $0x34] ss:$8 sps:$4 sm:$0xff]   ;;  %v1364_v14 = vld [vmem:[#allocation2 + $0x30] ss:$8 sps:$4 sm:$0xff]  }
  0x17   :  { %v1362_v13 = vld [vmem:[#allocation2 + $0x234] ss:$8 sps:$4 sm:$0xff]   ;;  %v1365_v15 = vld [vmem:[#allocation2 + $0x230] ss:$8 sps:$4 sm:$0xff]   ;;  %v1366_v16 = vld [vmem:[#allocation2 + $0x44] ss:$8 sps:$4 sm:$0xff]  }
  0x18   :  { %952 = vmatpush1.bf16.msra.mxu1 %v1352_v6  ;;  %v1368_v17 = vld [vmem:[#allocation2 + $0x244] ss:$8 sps:$4 sm:$0xff]   ;;  %v1370_v18 = vld [vmem:[#allocation2 + $0x40] ss:$8 sps:$4 sm:$0xff]   ;;  %v1372_v20 = vld [vmem:[#allocation2 + $0x54] ss:$8 sps:$4 sm:$0xff]  }
  0x19   :  { %1034 = vmatpush1.bf16.msra.mxu0 %v1353_v7  ;;  %953 = vmatprep.subr.bf16.mxu1 %v1354_v8  ;;  %v1371_v19 = vld [vmem:[#allocation2 + $0x240] ss:$8 sps:$4 sm:$0xff]   ;;  %v1374_v21 = vld [vmem:[#allocation2 + $0x254] ss:$8 sps:$4 sm:$0xff]   ;;  %v1376_v22 = vld [vmem:[#allocation2 + $0x50] ss:$8 sps:$4 sm:$0xff]  }
  0x1a   :  { %1035 = vmatprep.subr.bf16.mxu0 %v1356_v9  ;;  %v1377_v23 = vld [vmem:[#allocation2 + $0x250] ss:$8 sps:$4 sm:$0xff]   ;;  %v1378_v24 = vld [vmem:[#allocation2 + $0x64] ss:$8 sps:$4 sm:$0xff]   ;;  %v1382_v26 = vld [vmem:[#allocation2 + $0x60] ss:$8 sps:$4 sm:$0xff]  }
  0x1b   :  { %v1380_v25 = vld [vmem:[#allocation2 + $0x264] ss:$8 sps:$4 sm:$0xff]   ;;  %v1383_v27 = vld [vmem:[#allocation2 + $0x260] ss:$8 sps:$4 sm:$0xff]   ;;  %v1384_v28 = vld [vmem:[#allocation2 + $0x74] ss:$8 sps:$4 sm:$0xff]  }
  0x1c   :  { %954 = vmatpush1.bf16.msra.mxu1 %v1358_v10  ;;  %v1386_v29 = vld [vmem:[#allocation2 + $0x274] ss:$8 sps:$4 sm:$0xff]   ;;  %v1388_v30 = vld [vmem:[#allocation2 + $0x70] ss:$8 sps:$4 sm:$0xff]   ;;  %v1390_v32 = vld [vmem:[#allocation2 + $0x84] ss:$8 sps:$4 sm:$0xff]  }
  0x1d   :  { %1036 = vmatpush1.bf16.msra.mxu0 %v1359_v11  ;;  %955 = vmatprep.subr.bf16.mxu1 %v1360_v12  ;;  %v1389_v31 = vld [vmem:[#allocation2 + $0x270] ss:$8 sps:$4 sm:$0xff]   ;;  %v1392_v33 = vld [vmem:[#allocation2 + $0x284] ss:$8 sps:$4 sm:$0xff]   ;;  %v1394_v34 = vld [vmem:[#allocation2 + $0x80] ss:$8 sps:$4 sm:$0xff]  }
  0x1e   :  { %1037 = vmatprep.subr.bf16.mxu0 %v1362_v13  ;;  %v1395_v35 = vld [vmem:[#allocation2 + $0x280] ss:$8 sps:$4 sm:$0xff]   ;;  %v1587_v36 = vmov 1983009808   ;;  %v1396_v39 = vld [vmem:[#allocation2 + $0x94] ss:$8 sps:$4 sm:$0xff]  }
  0x1f   :  { %v181_v37 = vunpack.c.l.s4 %v1587_v36  ;;  %v1398_v40 = vld [vmem:[#allocation2 + $0x294] ss:$8 sps:$4 sm:$0xff]   ;;  %v1400_v41 = vld [vmem:[#allocation2 + $0x90] ss:$8 sps:$4 sm:$0xff]   ;;  %v1621_v43 = vshrl.u32 %v183_v38, 7  ;;  %v29_v52 = vld [vmem:[%s1651_s0] sm:$0xff] }
  0x20   :  { %956 = vmatpush1.bf16.msra.mxu1 %v1364_v14  ;;  %v1401_v44 = vld [vmem:[#allocation2 + $0x290] ss:$8 sps:$4 sm:$0xff]   ;;  %v1402_v45 = vld [vmem:[#allocation2 + $0xa4] ss:$8 sps:$4 sm:$0xff]   ;;  %v1406_v47 = vld [vmem:[#allocation2 + $0xa0] ss:$8 sps:$4 sm:$0xff]   ;;  %v179_v10 = vcombine.high %v29_v52, %v29_v52 }
  0x21   :  { %1038 = vmatpush1.bf16.msra.mxu0 %v1365_v15  ;;  %957 = vmatprep.subr.bf16.mxu1 %v1366_v16  ;;  %v182_v42 = vunpack.c.0.s8 %v181_v37  ;;  %v1404_v46 = vld [vmem:[#allocation2 + $0x2a4] ss:$8 sps:$4 sm:$0xff]   ;;  %v1407_v48 = vld [vmem:[#allocation2 + $0x2a0] ss:$8 sps:$4 sm:$0xff]   ;;  %v1408_v50 = vld [vmem:[#allocation2 + $0xb4] ss:$8 sps:$4 sm:$0xff]  }
  0x22   :  { %1039 = vmatprep.subr.bf16.mxu0 %v1368_v17  ;;  %v1410_v51 = vld [vmem:[#allocation2 + $0x2b4] ss:$8 sps:$4 sm:$0xff]   ;;  %v1412_v53 = vld [vmem:[#allocation2 + $0xb0] ss:$8 sps:$4 sm:$0xff]   ;;  %v30_v56 = vld [vmem:[%s1651_s0 + $0x8] sm:$0xff] }
  0x23   :  { %v185_v49 = vsub.s32 %v182_v42, %v1621_v43  ;;  %v1413_v55 = vld [vmem:[#allocation2 + $0x2b0] ss:$8 sps:$4 sm:$0xff]   ;;  %v1414_v57 = vld [vmem:[#allocation2 + $0xc4] ss:$8 sps:$4 sm:$0xff]   ;;  %v1418_v62 = vld [vmem:[#allocation2 + $0xc0] ss:$8 sps:$4 sm:$0xff]   ;;  %v196_v11 = vcombine.high %v30_v56, %v30_v56 }
  0x24   :  { %958 = vmatpush1.bf16.msra.mxu1 %v1370_v18  ;;  %v1416_v58 = vld [vmem:[#allocation2 + $0x2c4] ss:$8 sps:$4 sm:$0xff]   ;;  %v1419_v63 = vld [vmem:[#allocation2 + $0x2c0] ss:$8 sps:$4 sm:$0xff]   ;;  %v1420_v0 = vld [vmem:[#allocation2 + $0xd4] ss:$8 sps:$4 sm:$0xff]  }
  0x25   :  { %1040 = vmatpush1.bf16.msra.mxu0 %v1371_v19  ;;  %959 = vmatprep.subr.bf16.mxu1 %v1372_v20  ;;  %v186_v54 = vrot.slane %v29_v52, %v185_v49  ;;  %v203_v60 = vrot.slane %v30_v56, %v185_v49  ;;  %v1422_v1 = vld [vmem:[#allocation2 + $0x2d4] ss:$8 sps:$4 sm:$0xff]   ;;  %v1424_v2 = vld [vmem:[#allocation2 + $0xd0] ss:$8 sps:$4 sm:$0xff]   ;;  %v1426_v4 = vld [vmem:[#allocation2 + $0xe4] ss:$8 sps:$4 sm:$0xff]   ;;  %v1630_v16 = vrot.slane %v179_v10, %v185_v49 }
  0x26   :  { %1041 = vmatprep.subr.bf16.mxu0 %v1374_v21  ;;  %v1425_v3 = vld [vmem:[#allocation2 + $0x2d0] ss:$8 sps:$4 sm:$0xff]   ;;  %v1428_v5 = vld [vmem:[#allocation2 + $0x2e4] ss:$8 sps:$4 sm:$0xff]   ;;  %v1430_v6 = vld [vmem:[#allocation2 + $0xe0] ss:$8 sps:$4 sm:$0xff]   ;;  %v1632_v17 = vrot.slane %v196_v11, %v185_v49 }
  0x27   :  { %v194_v59 = vcombine.high %v186_v54, %v186_v54  ;;  %v211_v61 = vcombine.high %v203_v60, %v203_v60  ;;  %v1431_v7 = vld [vmem:[#allocation2 + $0x2e0] ss:$8 sps:$4 sm:$0xff]   ;;  %v1432_v8 = vld [vmem:[#allocation2 + $0xf4] ss:$8 sps:$4 sm:$0xff]   ;;  %v1436_v12 = vld [vmem:[#allocation2 + $0xf0] ss:$8 sps:$4 sm:$0xff]  }
  0x28   :  { %960 = vmatpush1.bf16.msra.mxu1 %v1376_v22  ;;  %v1434_v9 = vld [vmem:[#allocation2 + $0x2f4] ss:$8 sps:$4 sm:$0xff]   ;;  %v1437_v13 = vld [vmem:[#allocation2 + $0x2f0] ss:$8 sps:$4 sm:$0xff]   ;;  %v1441_v14 = vld [vmem:[#allocation2 + $0x104] ss:$8 sps:$4 sm:$0xff]   ;;  %v195_v22 = vcombine.high %v1630_v16, %v1630_v16 }
  0x29   :  { %1042 = vmatpush1.bf16.msra.mxu0 %v1377_v23  ;;  %961 = vmatprep.subr.bf16.mxu1 %v1378_v24  ;;  %v1445_v15 = vld [vmem:[#allocation2 + $0x304] ss:$8 sps:$4 sm:$0xff]   ;;  %v1439_v18 = vld [vmem:[#allocation2 + $0x100] ss:$8 sps:$4 sm:$0xff]   ;;  %v1448_v20 = vld [vmem:[#allocation2 + $0x114] ss:$8 sps:$4 sm:$0xff]   ;;  %v212_v23 = vcombine.high %v1632_v17, %v1632_v17 }
  0x2a   :  { %1043 = vmatprep.subr.bf16.mxu0 %v1380_v25  ;;  %981 = vmatprep.mubr.bf16.mxu1 %v194_v59  ;;  %v1443_v19 = vld [vmem:[#allocation2 + $0x300] ss:$8 sps:$4 sm:$0xff]   ;;  %v1451_v21 = vld [vmem:[#allocation2 + $0x314] ss:$8 sps:$4 sm:$0xff]   ;;  %v1446_v24 = vld [vmem:[#allocation2 + $0x110] ss:$8 sps:$4 sm:$0xff]  }
  0x2b   :  { %1063 = vmatprep.mubr.bf16.mxu0 %v211_v61  ;;  %v1449_v25 = vld [vmem:[#allocation2 + $0x310] ss:$8 sps:$4 sm:$0xff]   ;;  %v1464_v36 = vld [vmem:[#allocation2 + $0x140] ss:$8 sps:$4 sm:$0xff]   ;;  %v1472_v38 = vld [vmem:[#allocation2 + $0x154] ss:$8 sps:$4 sm:$0xff]  }
  0x2c   :  { %962 = vmatpush1.bf16.msra.mxu1 %v1382_v26  ;;  %v1454_v26 = vld [vmem:[#allocation2 + $0x124] ss:$8 sps:$4 sm:$0xff]   ;;  %v1467_v37 = vld [vmem:[#allocation2 + $0x340] ss:$8 sps:$4 sm:$0xff]   ;;  %v1482_v49 = vld [vmem:[#allocation2 + $0x170] ss:$8 sps:$4 sm:$0xff]  }
  0x2d   :  { %1044 = vmatpush1.bf16.msra.mxu0 %v1383_v27  ;;  %963 = vmatprep.subr.bf16.mxu1 %v1384_v28  ;;  %v1457_v27 = vld [vmem:[#allocation2 + $0x324] ss:$8 sps:$4 sm:$0xff]   ;;  %v1452_v28 = vld [vmem:[#allocation2 + $0x120] ss:$8 sps:$4 sm:$0xff]   ;;  %v1499_v56 = vld [vmem:[#allocation2 + $0x394] ss:$8 sps:$4 sm:$0xff]  }
  0x2e   :  { %1045 = vmatprep.subr.bf16.mxu0 %v1386_v29  ;;  %v1455_v29 = vld [vmem:[#allocation2 + $0x320] ss:$8 sps:$4 sm:$0xff]   ;;  %v1478_v42 = vld [vmem:[#allocation2 + $0x164] ss:$8 sps:$4 sm:$0xff]   ;;  %v1521_v10 = vld [vmem:[#allocation2 + $0x3d0] ss:$8 sps:$4 sm:$0xff]  }
  0x2f   :  { %v1493_v52 = vld [vmem:[#allocation2 + $0x384] ss:$8 sps:$4 sm:$0xff]   ;;  %v1500_v61 = vld [vmem:[#allocation2 + $0x1a0] ss:$8 sps:$4 sm:$0xff]  }
  0x30   :  { %964 = vmatpush1.bf16.msra.mxu1 %v1388_v30  ;;  %v1460_v30 = vld [vmem:[#allocation2 + $0x134] ss:$8 sps:$4 sm:$0xff]   ;;  %v1502_v59 = vld [vmem:[#allocation2 + $0x1a4] ss:$8 sps:$4 sm:$0xff]  }
  0x31   :  { %1046 = vmatpush1.bf16.msra.mxu0 %v1389_v31  ;;  %965 = vmatprep.subr.bf16.mxu1 %v1390_v32  ;;  %v1463_v31 = vld [vmem:[#allocation2 + $0x334] ss:$8 sps:$4 sm:$0xff]   ;;  %v1458_v32 = vld [vmem:[#allocation2 + $0x130] ss:$8 sps:$4 sm:$0xff]   ;;  %v1526_v11 = vld [vmem:[#allocation2 + $0x1e4] ss:$8 sps:$4 sm:$0xff]  }
  0x32   :  { %1047 = vmatprep.subr.bf16.mxu0 %v1392_v33  ;;  %v1461_v33 = vld [vmem:[#allocation2 + $0x330] ss:$8 sps:$4 sm:$0xff]  }
  0x34   :  { %966 = vmatpush1.bf16.msra.mxu1 %v1394_v34  ;;  %v1466_v34 = vld [vmem:[#allocation2 + $0x144] ss:$8 sps:$4 sm:$0xff]  }
  0x35   :  { %1048 = vmatpush1.bf16.msra.mxu0 %v1395_v35  ;;  %967 = vmatprep.subr.bf16.mxu1 %v1396_v39  ;;  %v1469_v35 = vld [vmem:[#allocation2 + $0x344] ss:$8 sps:$4 sm:$0xff]   ;;  %v1475_v39 = vld [vmem:[#allocation2 + $0x354] ss:$8 sps:$4 sm:$0xff]  }
  0x36   :  { %1049 = vmatprep.subr.bf16.mxu0 %v1398_v40  ;;  %v1470_v40 = vld [vmem:[#allocation2 + $0x150] ss:$8 sps:$4 sm:$0xff]  }
  0x38   :  { %968 = vmatpush1.bf16.msra.mxu1 %v1400_v41  ;;  %v1473_v41 = vld [vmem:[#allocation2 + $0x350] ss:$8 sps:$4 sm:$0xff]  }
  0x39   :  { %1050 = vmatpush1.bf16.msra.mxu0 %v1401_v44  ;;  %969 = vmatprep.subr.bf16.mxu1 %v1402_v45  ;;  %v1481_v44 = vld [vmem:[#allocation2 + $0x364] ss:$8 sps:$4 sm:$0xff]   ;;  %v1476_v45 = vld [vmem:[#allocation2 + $0x160] ss:$8 sps:$4 sm:$0xff]  }
  0x3a   :  { %1051 = vmatprep.subr.bf16.mxu0 %v1404_v46  ;;  %v1479_v46 = vld [vmem:[#allocation2 + $0x360] ss:$8 sps:$4 sm:$0xff]  }
  0x3c   :  { %970 = vmatpush1.bf16.msra.mxu1 %v1406_v47  ;;  %v1484_v47 = vld [vmem:[#allocation2 + $0x174] ss:$8 sps:$4 sm:$0xff]  }
  0x3d   :  { %1052 = vmatpush1.bf16.msra.mxu0 %v1407_v48  ;;  %971 = vmatprep.subr.bf16.mxu1 %v1408_v50  ;;  %v1487_v48 = vld [vmem:[#allocation2 + $0x374] ss:$8 sps:$4 sm:$0xff]   ;;  %v1485_v50 = vld [vmem:[#allocation2 + $0x370] ss:$8 sps:$4 sm:$0xff]  }
  0x3e   :  { %1053 = vmatprep.subr.bf16.mxu0 %v1410_v51  ;;  %v1490_v51 = vld [vmem:[#allocation2 + $0x184] ss:$8 sps:$4 sm:$0xff]  }
  0x40   :  { %972 = vmatpush1.bf16.msra.mxu1 %v1412_v53  ;;  %v1488_v53 = vld [vmem:[#allocation2 + $0x180] ss:$8 sps:$4 sm:$0xff]  }
  0x41   :  { %1054 = vmatpush1.bf16.msra.mxu0 %v1413_v55  ;;  %973 = vmatprep.subr.bf16.mxu1 %v1414_v57  ;;  %v1496_v55 = vld [vmem:[#allocation2 + $0x194] ss:$8 sps:$4 sm:$0xff]   ;;  %v1494_v57 = vld [vmem:[#allocation2 + $0x190] ss:$8 sps:$4 sm:$0xff]  }
  0x42   :  { %1055 = vmatprep.subr.bf16.mxu0 %v1416_v58  ;;  %v1497_v58 = vld [vmem:[#allocation2 + $0x390] ss:$8 sps:$4 sm:$0xff]  }
  0x44   :  { %974 = vmatpush1.bf16.msra.mxu1 %v1418_v62  ;;  %v1503_v62 = vld [vmem:[#allocation2 + $0x3a0] ss:$8 sps:$4 sm:$0xff]  }
  0x45   :  { %1056 = vmatpush1.bf16.msra.mxu0 %v1419_v63  ;;  %975 = vmatprep.subr.bf16.mxu1 %v1420_v0  ;;  %v1508_v63 = vld [vmem:[#allocation2 + $0x1b4] ss:$8 sps:$4 sm:$0xff]  }
  0x46   :  { %1057 = vmatprep.subr.bf16.mxu0 %v1422_v1  ;;  %v1511_v0 = vld [vmem:[#allocation2 + $0x3b4] ss:$8 sps:$4 sm:$0xff]   ;;  %v1506_v1 = vld [vmem:[#allocation2 + $0x1b0] ss:$8 sps:$4 sm:$0xff]  }
  0x48   :  { %976 = vmatpush1.bf16.msra.mxu1 %v1424_v2  ;;  %v1509_v2 = vld [vmem:[#allocation2 + $0x3b0] ss:$8 sps:$4 sm:$0xff]  }
  0x49   :  { %1058 = vmatpush1.bf16.msra.mxu0 %v1425_v3  ;;  %977 = vmatprep.subr.bf16.mxu1 %v1426_v4  ;;  %v1514_v3 = vld [vmem:[#allocation2 + $0x1c4] ss:$8 sps:$4 sm:$0xff]  }
  0x4a   :  { %1059 = vmatprep.subr.bf16.mxu0 %v1428_v5  ;;  %v1517_v4 = vld [vmem:[#allocation2 + $0x3c4] ss:$8 sps:$4 sm:$0xff]   ;;  %v1512_v5 = vld [vmem:[#allocation2 + $0x1c0] ss:$8 sps:$4 sm:$0xff]  }
  0x4c   :  { %978 = vmatpush1.bf16.msra.mxu1 %v1430_v6  ;;  %v1515_v6 = vld [vmem:[#allocation2 + $0x3c0] ss:$8 sps:$4 sm:$0xff]  }
  0x4d   :  { %1060 = vmatpush1.bf16.msra.mxu0 %v1431_v7  ;;  %979 = vmatprep.subr.bf16.mxu1 %v1432_v8  ;;  %v1520_v7 = vld [vmem:[#allocation2 + $0x1d4] ss:$8 sps:$4 sm:$0xff]  }
  0x4e   :  { %1061 = vmatprep.subr.bf16.mxu0 %v1434_v9  ;;  %v1523_v8 = vld [vmem:[#allocation2 + $0x3d4] ss:$8 sps:$4 sm:$0xff]   ;;  %v1518_v9 = vld [vmem:[#allocation2 + $0x1d0] ss:$8 sps:$4 sm:$0xff]  }
  0x50   :  { %980 = vmatpush1.bf16.msra.mxu1 %v1436_v12  ;;  %v1529_v12 = vld [vmem:[#allocation2 + $0x3e4] ss:$8 sps:$4 sm:$0xff]  }
  0x51   :  { %1062 = vmatpush1.bf16.msra.mxu0 %v1437_v13  ;;  %990 = vmatprep.subr.bf16.mxu1 %v1441_v14  ;;  %v1524_v13 = vld [vmem:[#allocation2 + $0x1e0] ss:$8 sps:$4 sm:$0xff]  }
  0x52   :  { %1072 = vmatprep.subr.bf16.mxu0 %v1445_v15  ;;  %v1527_v14 = vld [vmem:[#allocation2 + $0x3e0] ss:$8 sps:$4 sm:$0xff]   ;;  %v1532_v15 = vld [vmem:[#allocation2 + $0x1f4] ss:$8 sps:$4 sm:$0xff]  }
  0x53   :  { %982 = vmatmul.mubr.bf16.vlgmr.msra.gmra.mrb[0].mxu1 %v186_v54  ;;  %v1491_v54 = vld [vmem:[#allocation2 + $0x380] ss:$8 sps:$4 sm:$0xff]  }
  0x54   :  { %1064 = vmatmul.mubr.bf16.vlgmr.msra.gmra.mrb[0].mxu0 %v203_v60  ;;  %991 = vmatpush1.bf16.msra.mxu1 %v1439_v18  ;;  %v1505_v60 = vld [vmem:[#allocation2 + $0x3a4] ss:$8 sps:$4 sm:$0xff]   ;;  %v1535_v18 = vld [vmem:[#allocation2 + $0x3f4] ss:$8 sps:$4 sm:$0xff]  }
  0x55   :  { %1073 = vmatpush1.bf16.msra.mxu0 %v1443_v19  ;;  %992 = vmatprep.subr.bf16.mxu1 %v1448_v20  ;;  %v1530_v19 = vld [vmem:[#allocation2 + $0x1f0] ss:$8 sps:$4 sm:$0xff]  }
  0x56   :  { %1074 = vmatprep.subr.bf16.mxu0 %v1451_v21  ;;  %1022 = vmatprep.mubr.bf16.mxu1 %v195_v22  ;;  %v1533_v20 = vld [vmem:[#allocation2 + $0x3f0] ss:$8 sps:$4 sm:$0xff]   ;;  %v1538_v21 = vld [vmem:[#allocation2 + $0x404] ss:$8 sps:$4 sm:$0xff]   ;;  %v1536_v22 = vld [vmem:[#allocation2 + $0x400] ss:$8 sps:$4 sm:$0xff]  }
  0x57   :  { %1104 = vmatprep.mubr.bf16.mxu0 %v212_v23  ;;  %v1541_v23 = vld [vmem:[#allocation2 + $0x414] ss:$8 sps:$4 sm:$0xff]  }
  0x58   :  { %993 = vmatpush1.bf16.msra.mxu1 %v1446_v24  ;;  %v1539_v24 = vld [vmem:[#allocation2 + $0x410] ss:$8 sps:$4 sm:$0xff]  }
  0x59   :  { %1075 = vmatpush1.bf16.msra.mxu0 %v1449_v25  ;;  %994 = vmatprep.subr.bf16.mxu1 %v1454_v26  ;;  %v1588_v25 = vmov 0   ;;  %v1544_v26 = vld [vmem:[#allocation2 + $0x424] ss:$8 sps:$4 sm:$0xff]  }
  0x5a   :  { %1076 = vmatprep.subr.bf16.mxu0 %v1457_v27  ;;  %v1542_v27 = vld [vmem:[#allocation2 + $0x420] ss:$8 sps:$4 sm:$0xff]  }
  0x5c   :  { %995 = vmatpush1.bf16.msra.mxu1 %v1452_v28  ;;  %v1547_v28 = vld [vmem:[#allocation2 + $0x434] ss:$8 sps:$4 sm:$0xff]  }
  0x5d   :  { %1077 = vmatpush1.bf16.msra.mxu0 %v1455_v29  ;;  %996 = vmatprep.subr.bf16.mxu1 %v1460_v30  ;;  %v1545_v29 = vld [vmem:[#allocation2 + $0x430] ss:$8 sps:$4 sm:$0xff]   ;;  %v1550_v30 = vld [vmem:[#allocation2 + $0x444] ss:$8 sps:$4 sm:$0xff]  }
  0x5e   :  { %1078 = vmatprep.subr.bf16.mxu0 %v1463_v31  ;;  %v1548_v31 = vld [vmem:[#allocation2 + $0x440] ss:$8 sps:$4 sm:$0xff]  }
  0x60   :  { %997 = vmatpush1.bf16.msra.mxu1 %v1458_v32  ;;  %v1556_v32 = vld [vmem:[#allocation2 + $0x464] ss:$8 sps:$4 sm:$0xff]  }
  0x61   :  { %1079 = vmatpush1.bf16.msra.mxu0 %v1461_v33  ;;  %998 = vmatprep.subr.bf16.mxu1 %v1466_v34  ;;  %v1554_v33 = vld [vmem:[#allocation2 + $0x460] ss:$8 sps:$4 sm:$0xff]   ;;  %v1559_v34 = vld [vmem:[#allocation2 + $0x474] ss:$8 sps:$4 sm:$0xff]  }
  0x62   :  { %1080 = vmatprep.subr.bf16.mxu0 %v1469_v35  ;;  %v1557_v35 = vld [vmem:[#allocation2 + $0x470] ss:$8 sps:$4 sm:$0xff]  }
  0x64   :  { %999 = vmatpush1.bf16.msra.mxu1 %v1464_v36  ;;  %v1178_v36 = vld.sshfl [vmem:[%s1651_s0 + $0x10] sm:$0x3 pattern:$0x76325410] }
  0x65   :  { %1081 = vmatpush1.bf16.msra.mxu0 %v1467_v37  ;;  %1000 = vmatprep.subr.bf16.mxu1 %v1472_v38 }
  0x66   :  { %1082 = vmatprep.subr.bf16.mxu0 %v1475_v39 }
  0x68   :  { %1001 = vmatpush1.bf16.msra.mxu1 %v1470_v40 }
  0x69   :  { %1083 = vmatpush1.bf16.msra.mxu0 %v1473_v41  ;;  %1002 = vmatprep.subr.bf16.mxu1 %v1478_v42  ;;  %v1158_v41 = vsub.s32 0, %v1621_v43  ;;  %v1154_v42 = vld [vmem:[%s1653_s2] sm:$0x3] }
  0x6a   :  { %1084 = vmatprep.subr.bf16.mxu0 %v1481_v44  ;;  %v1162_v44 = vsub.s32 1, %v1621_v43 }
  0x6c   :  { %1003 = vmatpush1.bf16.msra.mxu1 %v1476_v45  ;;  %v1159_v45 = vrot.slane %v1154_v42, %v1158_v41 }
  0x6d   :  { %1085 = vmatpush1.bf16.msra.mxu0 %v1479_v46  ;;  %1004 = vmatprep.subr.bf16.mxu1 %v1484_v47  ;;  %v1163_v47 = vrot.slane %v1154_v42, %v1162_v44 }
  0x6e   :  { %1086 = vmatprep.subr.bf16.mxu0 %v1487_v48 }
  0x70   :  { %1005 = vmatpush1.bf16.msra.mxu1 %v1482_v49 }
  0x71   :  { %1087 = vmatpush1.bf16.msra.mxu0 %v1485_v50  ;;  %1006 = vmatprep.subr.bf16.mxu1 %v1490_v51 }
  0x72   :  { %1088 = vmatprep.subr.bf16.mxu0 %v1493_v52 }
  0x74   :  { %1007 = vmatpush1.bf16.msra.mxu1 %v1488_v53 }
  0x75   :  { %1089 = vmatpush1.bf16.msra.mxu0 %v1491_v54  ;;  %1008 = vmatprep.subr.bf16.mxu1 %v1496_v55 }
  0x76   :  { %1090 = vmatprep.subr.bf16.mxu0 %v1499_v56 }
  0x78   :  { %1009 = vmatpush1.bf16.msra.mxu1 %v1494_v57 }
  0x79   :  { %1091 = vmatpush1.bf16.msra.mxu0 %v1497_v58  ;;  %1010 = vmatprep.subr.bf16.mxu1 %v1502_v59 }
  0x7a   :  { %1092 = vmatprep.subr.bf16.mxu0 %v1505_v60 }
  0x7c   :  { %1011 = vmatpush1.bf16.msra.mxu1 %v1500_v61 }
  0x7d   :  { %1093 = vmatpush1.bf16.msra.mxu0 %v1503_v62  ;;  %1012 = vmatprep.subr.bf16.mxu1 %v1508_v63 }
  0x7e   :  { %1094 = vmatprep.subr.bf16.mxu0 %v1511_v0 }
  0x80   :  { %1013 = vmatpush1.bf16.msra.mxu1 %v1506_v1 }
  0x81   :  { %1095 = vmatpush1.bf16.msra.mxu0 %v1509_v2  ;;  %1014 = vmatprep.subr.bf16.mxu1 %v1514_v3 }
  0x82   :  { %1096 = vmatprep.subr.bf16.mxu0 %v1517_v4 }
  0x84   :  { %1015 = vmatpush1.bf16.msra.mxu1 %v1512_v5 }
  0x85   :  { %1097 = vmatpush1.bf16.msra.mxu0 %v1515_v6  ;;  %1016 = vmatprep.subr.bf16.mxu1 %v1520_v7 }
  0x86   :  { %1098 = vmatprep.subr.bf16.mxu0 %v1523_v8 }
  0x88   :  { %1017 = vmatpush1.bf16.msra.mxu1 %v1518_v9 }
  0x89   :  { %1099 = vmatpush1.bf16.msra.mxu0 %v1521_v10  ;;  %1018 = vmatprep.subr.bf16.mxu1 %v1526_v11 }
  0x8a   :  { %1100 = vmatprep.subr.bf16.mxu0 %v1529_v12 }
  0x8c   :  { %1019 = vmatpush1.bf16.msra.mxu1 %v1524_v13 }
  0x8d   :  { %1101 = vmatpush1.bf16.msra.mxu0 %v1527_v14  ;;  %1020 = vmatprep.subr.bf16.mxu1 %v1532_v15 }
  0x8e   :  { %1102 = vmatprep.subr.bf16.mxu0 %v1535_v18 }
  0x90   :  { %1021 = vmatpush1.bf16.msra.mxu1 %v1530_v19 }
  0x91   :  { %1103 = vmatpush1.bf16.msra.mxu0 %v1533_v20 }
  0x92   :  { %1113 = vmatprep.subr.bf16.mxu0 %v1538_v21 }
  0x93   :  { %1023 = vmatmul.mubr.bf16.vlgmr.msra.gmra.mrb[0].mxu1 %v1630_v16  ;;  %v1553_v16 = vld [vmem:[#allocation2 + $0x454] ss:$8 sps:$4 sm:$0xff]  }
  0x94   :  { %1105 = vmatmul.mubr.bf16.vlgmr.msra.gmra.mrb[0].mxu0 %v1632_v17  ;;  %v1551_v17 = vld [vmem:[#allocation2 + $0x450] ss:$8 sps:$4 sm:$0xff]  }
  0x95   :  { %1114 = vmatpush1.bf16.msra.mxu0 %v1536_v22  ;;  %1145 = vmatprep.mubr.bf16.mxu0 %v1588_v25 }
  0x96   :  { %1115 = vmatprep.subr.bf16.mxu0 %v1541_v23 }
  0x99   :  { %1116 = vmatpush1.bf16.msra.mxu0 %v1539_v24 }
  0x9a   :  { %1117 = vmatprep.subr.bf16.mxu0 %v1544_v26 }
  0x9d   :  { %1118 = vmatpush1.bf16.msra.mxu0 %v1542_v27 }
  0x9e   :  { %1119 = vmatprep.subr.bf16.mxu0 %v1547_v28 }
  0xa1   :  { %1120 = vmatpush1.bf16.msra.mxu0 %v1545_v29 }
  0xa2   :  { %1121 = vmatprep.subr.bf16.mxu0 %v1550_v30 }
  0xa5   :  { %1122 = vmatpush1.bf16.msra.mxu0 %v1548_v31 }
  0xa6   :  { %1123 = vmatprep.subr.bf16.mxu0 %v1553_v16 }
  0xa9   :  { %1124 = vmatpush1.bf16.msra.mxu0 %v1551_v17 }
  0xaa   :  { %1125 = vmatprep.subr.bf16.mxu0 %v1556_v32 }
  0xad   :  { %1126 = vmatpush1.bf16.msra.mxu0 %v1554_v33 }
  0xae   :  { %1127 = vmatprep.subr.bf16.mxu0 %v1559_v34 }
  0xb1   :  { %1128 = vmatpush1.bf16.msra.mxu0 %v1557_v35 }
  0xb4   :  { %1146 = vmatmul.mubr.bf16.vlgmr.msra.gmra.mrb[0].mxu0 %v1178_v36 }
 0x166   :  { %v1024_v37 = vpop.f32.mrb[0].mxu1 }
 0x167   :  { %v1026_v38 = vpop.f32.mrb[1].mxu1 }
 0x168   :  { %v1028_v39 = vpop.f32.mrb[2].mxu1 }
 0x169   :  { %v1029_v40 = vpop.f32.mrb[3].mxu1 }
 0x187   :  { %v1147_v46 = vpop.f32.mrb[0].mxu0 }
 0x188   :  { %v1323_v48 = vadd.f32 %v1147_v46, %v1024_v37  ;;  %v1149_v49 = vpop.f32.mrb[1].mxu0 }
 0x189   :  { %v1324_v50 = vadd.f32 %v1149_v49, %v1026_v38  ;;  %v1151_v51 = vpop.f32.mrb[2].mxu0 }
 0x18a   :  { %v1166_v52 = vmul.f32 %v1323_v48, %v1159_v45  ;;  %v1152_v53 = vpop.f32.mrb[3].mxu0 }
 0x18b   :  { %v1167_v54 = vmul.f32 %v1324_v50, %v1163_v47 }
 0x18d   :  { %v1170_v55 = vcombine.low %v1166_v52, %v1167_v54 }
 0x18f   :  { %1172 = vst [vmem:[%s1654_s3] sm:$0xff] %v1170_v55 }
 0x190   :  { %1177 = vsyncpa [#allocation3], 1 }

</bundles_post_ra>
